<compile_context>
chip_gen: v7x
topology: tpu7x:2x2x1
jax: 0.10.0
libtpu: 0.0.40
codegen_flags: <defaults>
</compile_context>

<pallas_src>
import jax
import jax.numpy as jnp
from jax.experimental import pallas as pl
from jax.experimental.pallas import tpu as pltpu


def _round_up(x, m):
    return ((x + m - 1) // m) * m


def _pick_divisor_tile(total, target, step=128):
    """Largest multiple of `step` <= target that divides `total` (a multiple of step)."""
    best = step
    t = step
    while t <= min(target, total):
        if total % t == 0:
            best = t
        t += step
    return best


# ---------------------------------------------------------------------------
# Kernels
# ---------------------------------------------------------------------------
def _matmul_bias_kernel(x_ref, w_ref, b_ref, o_ref):
    # Full-K path: x_ref (tm, K_p), w_ref (K_p, tn), b_ref (1, tn) f32.
    acc = jnp.dot(x_ref[...], w_ref[...], preferred_element_type=jnp.float32)
    o_ref[...] = (acc + b_ref[...]).astype(o_ref.dtype)


def _matmul_bias_kred_f32out_kernel(x_ref, w_ref, b_ref, o_ref):
    # K-reduction path, f32 output: accumulate directly into the resident
    # output block (no separate acc scratch).
    k = pl.program_id(2)

    @pl.when(k == 0)
    def _():
        o_ref[...] = jnp.broadcast_to(b_ref[...], o_ref.shape).astype(o_ref.dtype)

    o_ref[...] += jnp.dot(x_ref[...], w_ref[...], preferred_element_type=jnp.float32)


def _matmul_bias_kred_scratch_kernel(x_ref, w_ref, b_ref, o_ref, acc_ref):
    # K-reduction path, non-f32 output: f32 accumulator scratch.
    k = pl.program_id(2)

    @pl.when(k == 0)
    def _():
        acc_ref[...] = jnp.zeros_like(acc_ref)

    acc_ref[...] += jnp.dot(x_ref[...], w_ref[...], preferred_element_type=jnp.float32)

    @pl.when(k == pl.num_programs(2) - 1)
    def _():
        o_ref[...] = (acc_ref[...] + b_ref[...]).astype(o_ref.dtype)


# ---------------------------------------------------------------------------
# Wrapper / factory (parameter prep hoisted out of the per-forward path)
# ---------------------------------------------------------------------------
def make_linear_projection(weight, bias, *, compute_dtype=jnp.bfloat16,
                           tm_target=512, vmem_budget_bytes=36 * 1024 * 1024):
    """Build forward(x) for x of shape (B, N, H, W) with H * W == D_in.

    weight: (D_out, D_in), bias: (D_out,) -- same layout as torch nn.Linear.
    compute_dtype: MXU operand dtype (bf16 default; pass jnp.float32 for exact).
    """
    D_out, D_in = weight.shape
    assert bias.shape == (D_out,)

    compute_dtype = jnp.dtype(compute_dtype)
    op_bytes = compute_dtype.itemsize

    K_p = _round_up(D_in, 128)
    N_p = _round_up(D_out, 128)

    # One-time prep: (D_out, D_in) -> (D_in, D_out) so the kernel runs the
    # standard K-major contraction (no XLU transpose per step); cast + pad once.
    w_kn = jnp.asarray(weight).T.astype(compute_dtype)
    if (K_p, N_p) != (D_in, D_out):
        w_kn = jnp.pad(w_kn, ((0, K_p - D_in), (0, N_p - D_out)))
    b_row = jnp.asarray(bias, jnp.float32).reshape(1, D_out)
    if N_p != D_out:
        b_row = jnp.pad(b_row, ((0, 0), (0, N_p - D_out)))

    def forward(x):
        B, N, H, W = x.shape
        assert H * W == D_in, "input_dim must equal H*W"
        out_dtype = jnp.dtype(x.dtype)
        out_bytes = out_dtype.itemsize
        M = B * N

        # Row tile: big (512) for roofline, shrunk for small M; multiple of 16
        # for bf16 sublane packing (8 suffices for f32).
        align_m = 16 if compute_dtype == jnp.dtype(jnp.bfloat16) else 8
        tm = min(tm_target, _round_up(M, align_m))
        M_p = _round_up(M, tm)
        m_tiles = M_p // tm

        # Output tile: full N (weight fully VMEM-resident).  If only one row
        # tile exists, split D_out in two so both v7x TensorCores get work.
        tn = N_p
        if m_tiles < 2 and N_p >= 256 and N_p % 256 == 0:
            tn = N_p // 2
        tk = K_p  # full-K: no reduction axis, no accumulator round-trips

        def footprint(tm_, tn_, tk_, scratch):
            f = (2 * tm_ * tk_ * op_bytes      # double-buffered x tile
                 + 2 * tk_ * tn_ * op_bytes    # double-buffered weight tile
                 + 2 * tm_ * tn_ * out_bytes   # double-buffered output tile
                 + 2 * tn_ * 4)                # bias slab
            if scratch:
                f += tm_ * tn_ * 4
            return f

        # Shrink only if the full-K / full-N configuration would not fit the
        # v7x-safe VMEM budget.  (Never triggered for ViT-sized projections.)
        if footprint(tm, tn, tk, False) > vmem_budget_bytes:
            tn = _pick_divisor_tile(N_p, 512)
        if footprint(tm, tn, tk, False) > vmem_budget_bytes:
            tk = _pick_divisor_tile(K_p, 1024)
        need_scratch = (tk < K_p) and (out_dtype != jnp.dtype(jnp.float32))
        while footprint(tm, tn, tk, need_scratch) > vmem_budget_bytes and tm > 2 * align_m:
            tm = _round_up(tm // 2, align_m)
            M_p = _round_up(M, tm)
        m_tiles = M_p // tm
        n_tiles = N_p // tn

        # Flatten (H, W) and merge (B, N); cast operands; pad x only when the
        # shape is not already tile-aligned (common ViT case: no pad at all).
        x2 = x.reshape(M, D_in)
        if x2.dtype != compute_dtype:
            x2 = x2.astype(compute_dtype)
        if (M_p, K_p) != (M, D_in):
            x2 = jnp.pad(x2, ((0, M_p - M), (0, K_p - D_in)))

        cost = pl.CostEstimate(
            flops=2 * M * D_in * D_out,
            transcendentals=0,
            bytes_accessed=(M * D_in * op_bytes + D_in * D_out * op_bytes
                            + D_out * 4 + M * D_out * out_bytes),
        )
        cparams = pltpu.CompilerParams(
            dimension_semantics=(("parallel", "parallel") if tk == K_p
                                 else ("parallel", "parallel", "arbitrary")),
            vmem_limit_bytes=48 * 1024 * 1024,
        )

        if tk == K_p:
            # 2-D grid, whole (padded) weight resident per output tile.
            out = pl.pallas_call(
                _matmul_bias_kernel,
                out_shape=jax.ShapeDtypeStruct((M_p, N_p), out_dtype),
                grid_spec=pltpu.PrefetchScalarGridSpec(
                    num_scalar_prefetch=0,
                    grid=(m_tiles, n_tiles),
                    in_specs=[
                        pl.BlockSpec((tm, K_p), lambda i, j: (i, 0)),
                        pl.BlockSpec((K_p, tn), lambda i, j: (0, j)),
                        pl.BlockSpec((1, tn), lambda i, j: (0, j)),
                    ],
                    out_specs=pl.BlockSpec((tm, tn), lambda i, j: (i, j)),
                ),
                compiler_params=cparams,
                cost_estimate=cost,
            )(x2, w_kn, b_row)
        else:
            # Large-K fallback: 3-D grid with k-reduction innermost.
            k_tiles = K_p // tk
            in_specs = [
                pl.BlockSpec((tm, tk), lambda i, j, k: (i, k)),
                pl.BlockSpec((tk, tn), lambda i, j, k: (k, j)),
                pl.BlockSpec((1, tn), lambda i, j, k: (0, j)),
            ]
            out_spec = pl.BlockSpec((tm, tn), lambda i, j, k: (i, j))
            if out_dtype == jnp.dtype(jnp.float32):
                kernel, scratch = _matmul_bias_kred_f32out_kernel, []
            else:
                kernel = _matmul_bias_kred_scratch_kernel
                scratch = [pltpu.VMEM((tm, tn), jnp.float32)]
            out = pl.pallas_call(
                kernel,
                out_shape=jax.ShapeDtypeStruct((M_p, N_p), out_dtype),
                grid_spec=pltpu.PrefetchScalarGridSpec(
                    num_scalar_prefetch=0,
                    grid=(m_tiles, n_tiles, k_tiles),
                    in_specs=in_specs,
                    out_specs=out_spec,
                    scratch_shapes=scratch,
                ),
                compiler_params=cparams,
                cost_estimate=cost,
            )(x2, w_kn, b_row)

        return out[:M, :D_out].reshape(B, N, D_out)

    return jax.jit(forward)


def linear_projection(x, weight, bias, **kwargs):
    """Convenience one-shot wrapper (params prepared per call)."""
    return make_linear_projection(weight, bias, **kwargs)(x)


if __name__ == "__main__":
    # Small shapes consistent with the module: x (B, N, H, W); input_dim = H*W.
    B, N, H, W = 2, 4, 16, 16
    D_in = H * W          # 256
    D_out = 256           # module default output_dim

    key = jax.random.PRNGKey(0)
    kx, kw, kb = jax.random.split(key, 3)

    x = jax.random.normal(kx, (B, N, H, W), dtype=jnp.float32)
    bound = 1.0 / (D_in ** 0.5)
    weight = jax.random.uniform(kw, (D_out, D_in), jnp.float32, -bound, bound)
    bias = jax.random.uniform(kb, (D_out,), jnp.float32, -bound, bound)

    y_ref = x.reshape(B, N, D_in) @ weight.T + bias

    # Exact-dtype path (f32 operands): tight tolerance.
    proj_f32 = make_linear_projection(weight, bias, compute_dtype=jnp.float32)
    y32 = jax.block_until_ready(proj_f32(x))
    assert y32.shape == (B, N, D_out)
    assert jnp.allclose(y32, y_ref, atol=1e-4, rtol=1e-4)

    # Default fast path (bf16 operands, f32 accumulation) for v6e/v7x.
    proj_bf16 = make_linear_projection(weight, bias)
    ybf = jax.block_until_ready(proj_bf16(x))
    assert ybf.shape == (B, N, D_out)
    assert jnp.allclose(ybf, y_ref, atol=3e-2, rtol=3e-2)

    print("KERNEL_OK")
</pallas_src>

<mosaic_0001>
module attributes {stable_mosaic.version = 11 : i64} {
  func.func @_matmul_bias_kernel(%arg0: i32, %arg1: i32, %arg2: memref<8x256xf32, #tpu.memory_space<vmem>>, %arg3: memref<256x128xf32, #tpu.memory_space<vmem>>, %arg4: memref<1x128xf32, #tpu.memory_space<vmem>>, %arg5: memref<8x128xf32, #tpu.memory_space<vmem>>) attributes {dimension_semantics = [#tpu.dimension_semantics<parallel>, #tpu.dimension_semantics<parallel>], iteration_bounds = array<i64: 1, 2>, scalar_prefetch = 0 : i64, scratch_operands = 0 : i64, tpu.core_type = #tpu.core_type<tc>, window_params = [{transform_indices = @transform_0, window_bounds = array<i64: 8, 256>}, {transform_indices = @transform_1, window_bounds = array<i64: 256, 128>}, {transform_indices = @transform_2, window_bounds = array<i64: 1, 128>}, {transform_indices = @transform_3, window_bounds = array<i64: 8, 128>}]} {
    %c0 = arith.constant 0 : index
    %c0_0 = arith.constant 0 : index
    %0 = vector.load %arg2[%c0, %c0_0] : memref<8x256xf32, #tpu.memory_space<vmem>>, vector<8x256xf32>
    %c0_1 = arith.constant 0 : index
    %c0_2 = arith.constant 0 : index
    %1 = vector.load %arg3[%c0_1, %c0_2] : memref<256x128xf32, #tpu.memory_space<vmem>>, vector<256x128xf32>
    %cst = arith.constant dense<0.000000e+00> : vector<8x128xf32>
    %2 = tpu.matmul %0, %1, %cst {dimension_numbers = #tpu.dot_dimension_numbers<[1], [0], [0], [1], [0, 0, 1, 1], [], []>} : vector<8x256xf32>, vector<256x128xf32>, vector<8x128xf32> -> vector<8x128xf32>
    %c0_3 = arith.constant 0 : index
    %c0_4 = arith.constant 0 : index
    %3 = vector.load %arg4[%c0_3, %c0_4] : memref<1x128xf32, #tpu.memory_space<vmem>>, vector<1x128xf32>
    %4 = vector.broadcast %3 : vector<1x128xf32> to vector<8x128xf32>
    %5 = arith.addf %2, %4 : vector<8x128xf32>
    %c0_5 = arith.constant 0 : index
    %c0_6 = arith.constant 0 : index
    %6 = vector.load %arg5[%c0_5, %c0_6] : memref<8x128xf32, #tpu.memory_space<vmem>>, vector<8x128xf32>
    tpu.vector_store %arg5[%c0_5, %c0_6], %5 {strides = array<i32>} : memref<8x128xf32, #tpu.memory_space<vmem>>, vector<8x128xf32>,
    return
  }
  func.func @transform_0(%arg0: i32, %arg1: i32) -> (i32, i32) {
    %c0_i32 = arith.constant 0 : i32
    %c0_i32_0 = arith.constant 0 : i32
    return %arg0, %c0_i32 : i32, i32
  }
  func.func @transform_1(%arg0: i32, %arg1: i32) -> (i32, i32) {
    %c0_i32 = arith.constant 0 : i32
    %c0_i32_0 = arith.constant 0 : i32
    return %c0_i32, %arg1 : i32, i32
  }
  func.func @transform_2(%arg0: i32, %arg1: i32) -> (i32, i32) {
    %c0_i32 = arith.constant 0 : i32
    %c0_i32_0 = arith.constant 0 : i32
    return %c0_i32, %arg1 : i32, i32
  }
  func.func @transform_3(%arg0: i32, %arg1: i32) -> (i32, i32) {
    %c0_i32 = arith.constant 0 : i32
    return %arg0, %arg1 : i32, i32
  }
}

</mosaic_0001>

<bundles_post_ra>
// kernel: forward.1
= control target key start
LH: loop header
LB: loop body
LE: loop exit
PB: predicated region body
PF: predicated region fallthrough
CT: control target
= control target key end

     0   :  { %8 = vsyncpa [#allocation3], 0  ;;  %s882_s0 = inlined_call_operand.vmem [shape: f32[8,256], index: 0, kind: input, shape index: {}]   ;;  %s883_s1 = inlined_call_operand.hbm [shape: f32[256,256], index: 1, kind: input, shape index: {}]   ;;  %s884_s2 = inlined_call_operand.vmem [shape: f32[1,256], index: 2, kind: input, shape index: {}]   ;;  %s885_s3 = inlined_call_operand.vmem [shape: f32[8,256], index: 3, kind: output, shape index: {}]  }
   0x1   :  { %10 = vsyncpa [#allocation3 + $0x1], 0  ;;  %s713_s12 = smov 0   ;;  %s715_s13 = smov 0  }
   0x2   :  { %s717_s14 = smov 0   ;;  %s719_s15 = smov 0  }
   0x3   :  { %s721_s16 = smov 0   ;;  %s723_s17 = smov 0  }
   0x4 LB: > { %s469_s18 = sadd.s32 4294967295, %s687_s17   ;;  %s25_s19 = sadd.s32 1, %s683_s16  ;;  %s687_s17 = sphi %s723_s17, %s16_s17   ;;  %s683_s16 = sphi %s721_s16, %s894_s16   ;;  %s679_s15 = sphi %s719_s15, %s893_s15   ;;  %s675_s14 = sphi %s717_s14, %s892_s14   ;;  %s671_s13 = sphi %s715_s13, %s891_s13   ;;  %s667_s12 = sphi %s713_s12, %s890_s12  }
   0x5   : > { %p26_p0 = scmp.ge.s32.totalorder %s25_s19, 2  ;;  %s61_s20 = sadd.s32 1, %s675_s14 }
   0x6   : > { %p68_p1 = scmp.ne.s32.totalorder %s675_s14, %s671_s13  ;;  %p69_p2 = scmp.eq.s32.totalorder %s687_s17, 0 }
   0x7   : > { %s896_s19 = smov (%p26_p0, %s25_s19), 0  ;;  %p74_p4 = scmp.ne.s32.totalorder %s671_s13, %s667_s12 }
   0x8   : > { %p749_p3 = por %p69_p2, %p68_p1  ;;  %s58_s22 = ssub.s32 %s683_s16, %s896_s19 }
   0x9   : > { %p75_p5 = scmp.eq.s32.totalorder %s469_s18, 0  ;;  %p59_p6 = scmp.eq.s32.totalorder %s58_s22, 0 }
   0xa   : > { %p555_p8 = scmp.lt.s32.totalorder %s687_s17, 2  ;;  %s160_s25 = sand.u32 1, %s675_s14  }
   0xb   : > { %p756_p7 = por %p75_p5, %p74_p4  ;;  %s475_s26 = sshll.u32 %s683_s16, 7 }
   0xc   : > { %s762_s24 = scalar_select %p59_p6, %s675_s14, %s61_s20  }
   0xd   : > { %s474_s27 = sshll.u32 %s160_s25, 8  ;;  %s769_s30 = scalar_lea.hbm %s883_s1, %s475_s26 }
   0xe   : > { %s164_s4 = scalar_lea.vmem [#allocation2], %s474_s27  ;;  %p773_p9 = pnand %p555_p8, %p749_p3 }
   0xf   : > { %s170_s5 = sshll.u32 %s164_s4, 4  ;;  %s780_s7 = scalar_lea.sflag [#allocation3], %s160_s25  ;;  %s777_s5 = int_to_ptr.vmem [resolvable:$true] %s170_s5 }
  0x10   : > { %s607_s8 = scalar_lea.hbm %s769_s30, 4096  ;;  %p609_p12 = pneg %p773_p9 }
  0x11   : > { %p608_p11 = scmp.ne.s32.totalorder %s769_s30, %s607_s8  ;;  %s612_s11 = scalar_lea.hbm %s883_s1, 8192 }
  0x12   : > { %p613_p1 = scmp.lt.u32.totalorder %s769_s30, %s883_s1  ;;  %p614_p2 = scmp.lt.u32.totalorder %s612_s11, %s607_s8 }
  0x13   : > { %p610_p13 = pnand %p609_p12, %p608_p11  ;;  %p616_p4 = scmp.lt.u32.totalorder %s607_s8, %s769_s30 }
  0x14   : > { %p615_p3 = por %p614_p2, %p613_p1 }
  0x15   : > { %p611_p0 = pneg %p610_p13 }
  0x16   : > { %p617_p5 = por %p616_p4, %p615_p3 }
  0x18   : > { %p618_p6 = pnand %p617_p5, %p611_p0 }
  0x1a   : > { %621 = shalt.err (!%p618_p6)
}
  0x1b   : > { %s622_s20 = scalar_lea.vmem %s777_s5, 4096  ;;  %s689_s21 = smov [#allocation2]  }
  0x1c   : > { %p623_p8 = scmp.ne.s32.totalorder %s777_s5, %s622_s20  ;;  %s627_s22 = sshll.u32 %s689_s21, 4  ;;  %s628_s22 = int_to_ptr.vmem [resolvable:$false] %s627_s22 }
  0x1d   : > { %s629_s25 = scalar_lea.vmem %s628_s22, 8192  ;;  %p630_p10 = scmp.lt.s32.totalorder %s777_s5, %s628_s22 }
  0x1e   : > { %p625_p11 = pnand %p623_p8, %p609_p12  ;;  %p631_p1 = scmp.lt.s32.totalorder %s629_s25, %s622_s20 }
  0x20   : > { %p626_p13 = pneg %p625_p11  ;;  %p632_p2 = por %p631_p1, %p630_p10 }
  0x22   : > { %p633_p3 = pnand %p632_p2, %p626_p13 }
  0x24   : > { %636 = shalt.err (!%p633_p3)
}
  0x25   : > { %s690_s26 = smov 256   ;;  %s691_s27 = smov 128  }
  0x26   : > { %s692_s28 = smov 8   ;;  %p184_p12 = scmp.lt.s32.totalorder %s687_s17, 3 }
  0x27   : > { %554 = dma.hbm_to_vmem [thread:$0]  (!%p773_p9), %s769_s30, 4096, %s777_s5, %s780_s7, %s690_s26, %s691_s27, %s692_s28  }
  0x28   : > { %p889_p0 = scmp.ge.s32.totalorder %s687_s17, 1 }
  0x2a   : > { %p185_p4 = pnand %p889_p0, %p184_p12 }
  0x2b   : > { %s190_s29 = sand.u32 (!%p185_p4), 1, %s671_s13  }
  0x2c   : > { %188 = sbr.rel (%p185_p4) target bundleno = 305 (0x131), region = 32  ;;  %s477_s4 = sshll.u32 (!%p185_p4), %s190_s29, 8 }
  0x2d   : > { %s191_s8 = scalar_lea.sflag (!%p185_p4), [#allocation3], %s190_s29  ;;  %s812_s9 = scalar_lea.vmem (!%p185_p4), [#allocation2], %s477_s4 }
  0x33   : > { %662 = dma.done.wait (%p756_p7), %s191_s8, 4096  }
  0x34   : > { %664 = vsyncadd (%p756_p7), %s191_s8, 4294963200  ;;  %v262_v0 = vld [vmem:[%s812_s9 + $0x80] sm:$0xff]  ;;  %v263_v1 = vld [vmem:[%s812_s9 + $0x88] sm:$0xff]  ;;  %p233_p7 = scmp.lt.s32.totalorder %s679_s15, 1 }
  0x35   : > { %v246_v2 = vld [vmem:[%s812_s9] sm:$0xff]  ;;  %v517_v3 = vpack.c.bf16 %v263_v1, %v262_v0  ;;  %v247_v4 = vld [vmem:[%s812_s9 + $0x8] sm:$0xff]  ;;  %v264_v5 = vld [vmem:[%s812_s9 + $0x90] sm:$0xff] }
  0x36   : > { %v265_v6 = vld [vmem:[%s812_s9 + $0x98] sm:$0xff]  ;;  %v519_v7 = vpack.c.bf16 %v247_v4, %v246_v2  ;;  %v248_v9 = vld [vmem:[%s812_s9 + $0x10] sm:$0xff]  ;;  %v266_v11 = vld [vmem:[%s812_s9 + $0xa0] sm:$0xff]  ;;  %s898_s15 = smov (!%p233_p7, %s679_s15), 1 }
  0x37   : > { %v521_v8 = vpack.c.bf16 %v265_v6, %v264_v5  ;;  %v249_v10 = vld [vmem:[%s812_s9 + $0x18] sm:$0xff]  ;;  %518 = vmatprep.subr.bf16.mxu0 %v517_v3  ;;  %v267_v12 = vld [vmem:[%s812_s9 + $0xa8] sm:$0xff]  ;;  %v250_v15 = vld [vmem:[%s812_s9 + $0x20] sm:$0xff]  ;;  %s235_s11 = scalar_lea.vmem %s884_s2, %s898_s15  ;;  %s478_s12 = sshll.u32 %s898_s15, 3 }
  0x38   : > { %520 = vmatpush3.bf16.msra.mxu0 %v519_v7  ;;  %v523_v13 = vpack.c.bf16 %v249_v10, %v248_v9  ;;  %v525_v14 = vpack.c.bf16 %v267_v12, %v266_v11  ;;  %v251_v16 = vld [vmem:[%s812_s9 + $0x28] sm:$0xff]  ;;  %v268_v17 = vld [vmem:[%s812_s9 + $0xb0] sm:$0xff]  ;;  %v269_v18 = vld [vmem:[%s812_s9 + $0xb8] sm:$0xff]  ;;  %s243_s21 = scalar_lea.vmem %s885_s3, %s478_s12 }
  0x39   : > { %522 = vmatprep.subr.bf16.mxu0 %v521_v8  ;;  %v527_v19 = vpack.c.bf16 %v251_v16, %v250_v15  ;;  %v529_v20 = vpack.c.bf16 %v269_v18, %v268_v17  ;;  %v252_v21 = vld [vmem:[%s812_s9 + $0x30] sm:$0xff]  ;;  %v253_v22 = vld [vmem:[%s812_s9 + $0x38] sm:$0xff]  ;;  %v270_v23 = vld [vmem:[%s812_s9 + $0xc0] sm:$0xff] }
  0x3a   : > { %v271_v24 = vld [vmem:[%s812_s9 + $0xc8] sm:$0xff]  ;;  %v531_v26 = vpack.c.bf16 %v253_v22, %v252_v21  ;;  %v254_v28 = vld [vmem:[%s812_s9 + $0x40] sm:$0xff]  ;;  %v272_v30 = vld [vmem:[%s812_s9 + $0xd0] sm:$0xff] }
  0x3b   : > { %v245_v25 = vld [vmem:[%s882_s0 + $0x8] sm:$0xff]  ;;  %v533_v27 = vpack.c.bf16 %v271_v24, %v270_v23  ;;  %v273_v31 = vld [vmem:[%s812_s9 + $0xd8] sm:$0xff]  ;;  %v256_v34 = vld [vmem:[%s812_s9 + $0x50] sm:$0xff] }
  0x3c   : > { %524 = vmatpush3.bf16.msra.mxu0 %v523_v13  ;;  %349 = vmatprep.mubr.f32.mxu0 %v245_v25  ;;  %v255_v29 = vld [vmem:[%s812_s9 + $0x48] sm:$0xff]  ;;  %v537_v33 = vpack.c.bf16 %v273_v31, %v272_v30  ;;  %v257_v35 = vld [vmem:[%s812_s9 + $0x58] sm:$0xff]  ;;  %v274_v36 = vld [vmem:[%s812_s9 + $0xe0] sm:$0xff] }
  0x3d   : > { %526 = vmatprep.subr.bf16.mxu0 %v525_v14  ;;  %v535_v32 = vpack.c.bf16 %v255_v29, %v254_v28  ;;  %v275_v37 = vld [vmem:[%s812_s9 + $0xe8] sm:$0xff]  ;;  %v539_v38 = vpack.c.bf16 %v257_v35, %v256_v34  ;;  %v258_v40 = vld [vmem:[%s812_s9 + $0x60] sm:$0xff]  ;;  %v276_v42 = vld [vmem:[%s812_s9 + $0xf0] sm:$0xff] }
  0x3e   : > { %v541_v39 = vpack.c.bf16 %v275_v37, %v274_v36  ;;  %v259_v41 = vld [vmem:[%s812_s9 + $0x68] sm:$0xff]  ;;  %v277_v43 = vld [vmem:[%s812_s9 + $0xf8] sm:$0xff]  ;;  %v260_v46 = vld [vmem:[%s812_s9 + $0x70] sm:$0xff] }
  0x3f   : > { %v543_v44 = vpack.c.bf16 %v259_v41, %v258_v40  ;;  %v545_v45 = vpack.c.bf16 %v277_v43, %v276_v42  ;;  %v261_v47 = vld [vmem:[%s812_s9 + $0x78] sm:$0xff]  ;;  %v244_v49 = vld [vmem:[%s882_s0] sm:$0xff] }
  0x40   : > { %528 = vmatpush3.bf16.msra.mxu0 %v527_v19  ;;  %v547_v48 = vpack.c.bf16 %v261_v47, %v260_v46  ;;  %v479_v51 = vld [vmem:[%s235_s11] ss:$0 sm:$0xff] }
  0x41   : > { %530 = vmatprep.subr.bf16.mxu0 %v529_v20 }
  0x44   : > { %532 = vmatpush3.bf16.msra.mxu0 %v531_v26 }
  0x45   : > { %534 = vmatprep.subr.bf16.mxu0 %v533_v27 }
  0x48   : > { %536 = vmatpush3.bf16.msra.mxu0 %v535_v32 }
  0x49   : > { %538 = vmatprep.subr.bf16.mxu0 %v537_v33 }
  0x4c   : > { %540 = vmatpush3.bf16.msra.mxu0 %v539_v38 }
  0x4d   : > { %542 = vmatprep.subr.bf16.mxu0 %v541_v39 }
  0x50   : > { %544 = vmatpush3.bf16.msra.mxu0 %v543_v44 }
  0x51   : > { %546 = vmatprep.subr.bf16.mxu0 %v545_v45 }
  0x54   : > { %548 = vmatpush3.bf16.msra.mxu0 %v547_v48 }
  0x57   : > { %350 = vmatmul.mubr.f32.vlgmr.msra.gmra.mrb[0].mxu0 %v244_v49 }
 0x12a   : > { %v514_v50 = vpop.f32.mrb[0].mxu0 }
 0x12b   : > { %v515_v52 = vpop.f32.mrb[1].mxu0 }
 0x12c   : > { %v516_v53 = vadd.f32 %v515_v52, %v514_v50 }
 0x12e   : > { %v352_v54 = vadd.f32 %v516_v53, %v479_v51 }
 0x130   : > { %355 = vst [vmem:[%s243_s21] sm:$0xff] %v352_v54 }
 0x131 PF: > { %s16_s17 = sadd.s32 1, %s687_s17   ;;  %s890_s12 = smov %s671_s13 }
 0x132   : > { %p13_p9 = scmp.ge.s32.totalorder %s16_s17, 4   ;;  %s891_s13 = smov %s675_s14 }
 0x133   : > { %s892_s14 = smov %s762_s24  ;;  %s893_s15 = smov %s683_s16 }
 0x134   : > { %s894_s16 = smov %s896_s19  ;;  %15 = sbr.rel (!%p13_p9) target bundleno = 4 (0x4), region = 78 }
 0x13b   :  { %383 = vsyncpa [#allocation3], 1 }
 0x13c   :  { %385 = vsyncpa [#allocation3 + $0x1], 1 }

</bundles_post_ra>
